<compile_context>
chip_gen: v6e
topology: v6e:2x2x1
jax: 0.10.0
libtpu: 0.0.40
codegen_flags: <defaults>
</compile_context>

<pallas_src>
import functools

import jax
import jax.numpy as jnp
from jax import lax
from jax.experimental import pallas as pl
from jax.experimental.pallas import tpu as pltpu


def _round_up(n, m):
    return ((n + m - 1) // m) * m


def _gate_kernel(x_ref, w1_ref, b1_ref, w2_ref, b2_ref, out_ref, *,
                 hard, threshold):
    """Fused: Linear(in,128) -> ReLU -> Linear(128,K) -> DiffSoftmax (forward)."""
    x = x_ref[...]  # f32 or bf16 tile; no extra cast — MXU takes both natively

    # MLP layer 1 + ReLU (accumulate in f32 on the MXU)
    h = jnp.dot(x, w1_ref[...], preferred_element_type=jnp.float32) + b1_ref[...]
    h = jnp.maximum(h, 0.0)

    # MLP layer 2 -> logits
    logits = jnp.dot(h, w2_ref[...], preferred_element_type=jnp.float32) + b2_ref[...]

    # softmax(logits / tau), tau = 1.0, dim = -1
    m = jnp.max(logits, axis=-1, keepdims=True)
    e = jnp.exp(logits - m)
    denom = jnp.sum(e, axis=-1, keepdims=True)
    y_soft = e * pl.reciprocal(denom, approx=True)   # EUP slot, otherwise idle

    if hard:
        if threshold is not None:
            # matches the PyTorch reference: keep soft values above threshold
            ret = y_soft * (y_soft >= threshold).astype(jnp.float32)
        else:
            # one-hot at argmax (first occurrence on ties, matching torch.max)
            # argmax(softmax) == argmax(logits) (monotone), so use logits.
            cols = lax.broadcasted_iota(jnp.int32, logits.shape, dimension=1)
            big = jnp.int32(logits.shape[-1])
            idx = jnp.min(jnp.where(logits == m, cols, big),
                          axis=-1, keepdims=True)
            ret = (cols == idx).astype(jnp.float32)
        # forward value of (y_hard - y_soft.detach() + y_soft) is exactly y_hard
    else:
        ret = y_soft

    # single lane-packed store: [weight | x_soft] of width 2K
    out_ref[...] = jnp.concatenate([ret, y_soft], axis=-1)


def gate_net_forward(x, w1, b1, w2, b2, *, hard=True, threshold=None,
                     block_b=4096, input_dtype=None):
    """Pallas implementation of GateNet.forward -> (weight, x_soft)."""
    B, D = x.shape
    K = w2.shape[1]

    if input_dtype is not None:
        # halve the dominant HBM stream (x) and the resident w1
        x = x.astype(input_dtype)
        w1 = w1.astype(input_dtype)

    # batch tile: multiple of 8 sublanes, capped so tiles + double buffers
    # stay well inside the 32 MiB scoped-VMEM budget (v7x-safe)
    tb = max(8, min(_round_up(block_b, 8), _round_up(B, 8)))
    Bp = _round_up(B, tb)
    if Bp != B:
        x = jnp.pad(x, ((0, Bp - B), (0, 0)))

    kernel = functools.partial(_gate_kernel, hard=hard, threshold=threshold)

    out = pl.pallas_call(
        kernel,
        out_shape=jax.ShapeDtypeStruct((Bp, 2 * K), jnp.float32),
        grid=(pl.cdiv(Bp, tb),),
        in_specs=[
            # streamed, double-buffered batch tiles
            pl.BlockSpec((tb, D), lambda i: (i, 0)),
            # parameters: constant index_map -> DMA'd once, resident in VMEM
            pl.BlockSpec(w1.shape, lambda i: (0, 0)),
            pl.BlockSpec(b1.shape, lambda i: (0, 0)),
            pl.BlockSpec(w2.shape, lambda i: (0, 0)),
            pl.BlockSpec(b2.shape, lambda i: (0, 0)),
        ],
        out_specs=pl.BlockSpec((tb, 2 * K), lambda i: (i, 0)),
        compiler_params=pltpu.CompilerParams(
            dimension_semantics=("parallel",)),   # megacore split on v7x
    )(x, w1, b1, w2, b2)

    weight = out[:B, :K]
    x_soft = out[:B, K:]
    return weight, x_soft


def init_params(key, input_dim, branch_num, hidden=128):
    """Deterministic PyTorch-style (uniform +-1/sqrt(fan_in)) init."""
    k1, k2, k3, k4 = jax.random.split(key, 4)
    bound1 = 1.0 / jnp.sqrt(input_dim)
    bound2 = 1.0 / jnp.sqrt(hidden)
    w1 = jax.random.uniform(k1, (input_dim, hidden), jnp.float32, -bound1, bound1)
    b1 = jax.random.uniform(k2, (1, hidden), jnp.float32, -bound1, bound1)
    w2 = jax.random.uniform(k3, (hidden, branch_num), jnp.float32, -bound2, bound2)
    b2 = jax.random.uniform(k4, (1, branch_num), jnp.float32, -bound2, bound2)
    return w1, b1, w2, b2


if __name__ == "__main__":
    INPUT_DIM, BRANCH_NUM, HIDDEN = 32, 4, 128

    key = jax.random.PRNGKey(0)
    kx, kp, kx2 = jax.random.split(key, 3)
    w1, b1, w2, b2 = init_params(kp, INPUT_DIM, BRANCH_NUM, HIDDEN)

    def reference(x):
        h = jnp.maximum(x @ w1 + b1, 0.0)
        logits = h @ w2 + b2
        soft = jax.nn.softmax(logits, axis=-1)
        onehot = jax.nn.one_hot(jnp.argmax(logits, axis=-1), BRANCH_NUM,
                                dtype=jnp.float32)
        return onehot, soft

    # --- module defaults: hard=True, threshold=None, f32 ---
    B = 8
    x = jax.random.normal(kx, (B, INPUT_DIM), jnp.float32)
    weight, x_soft = gate_net_forward(x, w1, b1, w2, b2, hard=True, threshold=None)
    jax.block_until_ready((weight, x_soft))
    onehot_ref, soft_ref = reference(x)
    assert jnp.allclose(x_soft, soft_ref, atol=5e-3), "soft mismatch"
    assert jnp.allclose(weight, onehot_ref, atol=1e-5), "hard one-hot mismatch"
    assert jnp.allclose(jnp.sum(x_soft, axis=-1), 1.0, atol=5e-3)

    # --- threshold variant; batch not a multiple of the block (exercises pad) ---
    B2 = 13
    x2 = jax.random.normal(kx2, (B2, INPUT_DIM), jnp.float32)
    w_thr, s_thr = gate_net_forward(x2, w1, b1, w2, b2, hard=True, threshold=0.3)
    jax.block_until_ready((w_thr, s_thr))
    _, soft_ref2 = reference(x2)
    assert jnp.allclose(s_thr, soft_ref2, atol=5e-3)
    assert jnp.allclose(w_thr, s_thr * (s_thr >= 0.3).astype(jnp.float32), atol=1e-6)

    # --- bf16 input stream (perf option): same outputs, looser tolerance ---
    w_bf, s_bf = gate_net_forward(x, w1, b1, w2, b2, hard=True, threshold=None,
                                  input_dtype=jnp.bfloat16)
    jax.block_until_ready((w_bf, s_bf))
    assert jnp.allclose(s_bf, soft_ref, atol=5e-2)
    assert bool(jnp.all((w_bf == 0.0) | (w_bf == 1.0)))
    assert jnp.allclose(jnp.sum(w_bf, axis=-1), 1.0)

    print("KERNEL_OK")
</pallas_src>

<mosaic_0001>
module attributes {stable_mosaic.version = 11 : i64} {
  func.func @_gate_kernel(%arg0: i32, %arg1: memref<8x32xf32, #tpu.memory_space<vmem>>, %arg2: memref<32x128xf32, #tpu.memory_space<vmem>>, %arg3: memref<1x128xf32, #tpu.memory_space<vmem>>, %arg4: memref<128x4xf32, #tpu.memory_space<vmem>>, %arg5: memref<1x4xf32, #tpu.memory_space<vmem>>, %arg6: memref<8x8xf32, #tpu.memory_space<vmem>>) attributes {dimension_semantics = [#tpu.dimension_semantics<parallel>], iteration_bounds = array<i64: 1>, scalar_prefetch = 0 : i64, scratch_operands = 0 : i64, tpu.core_type = #tpu.core_type<tc>, window_params = [{transform_indices = @transform_0, window_bounds = array<i64: 8, 32>}, {pipeline_mode = #tpu.pipeline_mode<synchronous>, transform_indices = @transform_1, window_bounds = array<i64: 32, 128>}, {pipeline_mode = #tpu.pipeline_mode<synchronous>, transform_indices = @transform_2, window_bounds = array<i64: 1, 128>}, {pipeline_mode = #tpu.pipeline_mode<synchronous>, transform_indices = @transform_3, window_bounds = array<i64: 128, 4>}, {pipeline_mode = #tpu.pipeline_mode<synchronous>, transform_indices = @transform_4, window_bounds = array<i64: 1, 4>}, {transform_indices = @transform_5, window_bounds = array<i64: 8, 8>}]} {
    %c0 = arith.constant 0 : index
    %c0_0 = arith.constant 0 : index
    %0 = vector.load %arg1[%c0, %c0_0] : memref<8x32xf32, #tpu.memory_space<vmem>>, vector<8x32xf32>
    %c0_1 = arith.constant 0 : index
    %c0_2 = arith.constant 0 : index
    %1 = vector.load %arg2[%c0_1, %c0_2] : memref<32x128xf32, #tpu.memory_space<vmem>>, vector<32x128xf32>
    %cst = arith.constant dense<0.000000e+00> : vector<8x128xf32>
    %2 = tpu.matmul %0, %1, %cst {dimension_numbers = #tpu.dot_dimension_numbers<[1], [0], [0], [1], [0, 0, 1, 1], [], []>} : vector<8x32xf32>, vector<32x128xf32>, vector<8x128xf32> -> vector<8x128xf32>
    %c0_3 = arith.constant 0 : index
    %c0_4 = arith.constant 0 : index
    %3 = vector.load %arg3[%c0_3, %c0_4] : memref<1x128xf32, #tpu.memory_space<vmem>>, vector<1x128xf32>
    %4 = vector.broadcast %3 : vector<1x128xf32> to vector<8x128xf32>
    %5 = arith.addf %2, %4 : vector<8x128xf32>
    %cst_5 = arith.constant 0.000000e+00 : f32
    %6 = vector.broadcast %cst_5 : f32 to vector<8x128xf32>
    %7 = arith.maximumf %5, %6 : vector<8x128xf32>
    %c0_6 = arith.constant 0 : index
    %c0_7 = arith.constant 0 : index
    %8 = vector.load %arg4[%c0_6, %c0_7] : memref<128x4xf32, #tpu.memory_space<vmem>>, vector<128x4xf32>
    %cst_8 = arith.constant dense<0.000000e+00> : vector<8x4xf32>
    %9 = tpu.matmul %7, %8, %cst_8 {dimension_numbers = #tpu.dot_dimension_numbers<[1], [0], [0], [1], [0, 0, 1, 1], [], []>} : vector<8x128xf32>, vector<128x4xf32>, vector<8x4xf32> -> vector<8x4xf32>
    %c0_9 = arith.constant 0 : index
    %c0_10 = arith.constant 0 : index
    %10 = vector.load %arg5[%c0_9, %c0_10] : memref<1x4xf32, #tpu.memory_space<vmem>>, vector<1x4xf32>
    %11 = vector.broadcast %10 : vector<1x4xf32> to vector<8x4xf32>
    %12 = arith.addf %9, %11 : vector<8x4xf32>
    %cst_11 = arith.constant dense<0xFF800000> : vector<8xf32>
    %13 = vector.multi_reduction <maximumf>, %12, %cst_11 [1] : vector<8x4xf32> to vector<8xf32>
    %14 = vector.shape_cast %13 : vector<8xf32> to vector<8x1xf32>
    %15 = vector.broadcast %14 : vector<8x1xf32> to vector<8x4xf32>
    %16 = arith.subf %12, %15 : vector<8x4xf32>
    %17 = math.exp %16 : vector<8x4xf32>
    %cst_12 = arith.constant dense<0.000000e+00> : vector<8xf32>
    %18 = vector.multi_reduction <add>, %17, %cst_12 [1] : vector<8x4xf32> to vector<8xf32>
    %19 = vector.shape_cast %18 : vector<8xf32> to vector<8x1xf32>
    %20 = tpu.reciprocal %19 {approx = true} : vector<8x1xf32> -> vector<8x1xf32>
    %21 = vector.broadcast %20 : vector<8x1xf32> to vector<8x4xf32>
    %22 = arith.mulf %17, %21 : vector<8x4xf32>
    %23 = tpu.iota {dimensions = array<i32: 1>} : vector<8x4xi32>
    %24 = vector.broadcast %14 : vector<8x1xf32> to vector<8x4xf32>
    %25 = arith.cmpf oeq, %12, %24 : vector<8x4xf32>
    %c4_i32 = arith.constant 4 : i32
    %26 = vector.broadcast %c4_i32 : i32 to vector<8x4xi32>
    %27 = arith.select %25, %23, %26 : vector<8x4xi1>, vector<8x4xi32>
    %cst_13 = arith.constant dense<2147483647> : vector<8xi32>
    %28 = vector.multi_reduction <minsi>, %27, %cst_13 [1] : vector<8x4xi32> to vector<8xi32>
    %29 = vector.shape_cast %28 : vector<8xi32> to vector<8x1xi32>
    %30 = vector.broadcast %29 : vector<8x1xi32> to vector<8x4xi32>
    %31 = arith.cmpi eq, %23, %30 : vector<8x4xi32>
    %32 = arith.extui %31 : vector<8x4xi1> to vector<8x4xi32>
    %33 = arith.sitofp %32 : vector<8x4xi32> to vector<8x4xf32>
    %34 = tpu.concatenate %33, %22 in 1 : vector<8x4xf32>, vector<8x4xf32> -> vector<8x8xf32>
    %c0_14 = arith.constant 0 : index
    %c0_15 = arith.constant 0 : index
    %35 = vector.load %arg6[%c0_14, %c0_15] : memref<8x8xf32, #tpu.memory_space<vmem>>, vector<8x8xf32>
    tpu.vector_store %arg6[%c0_14, %c0_15], %34 {strides = array<i32>} : memref<8x8xf32, #tpu.memory_space<vmem>>, vector<8x8xf32>,
    return
  }
  func.func @transform_0(%arg0: i32) -> (i32, i32) {
    %c0_i32 = arith.constant 0 : i32
    %c0_i32_0 = arith.constant 0 : i32
    return %arg0, %c0_i32 : i32, i32
  }
  func.func @transform_1(%arg0: i32) -> (i32, i32) {
    %c0_i32 = arith.constant 0 : i32
    %c0_i32_0 = arith.constant 0 : i32
    %c0_i32_1 = arith.constant 0 : i32
    return %c0_i32, %c0_i32_0 : i32, i32
  }
  func.func @transform_2(%arg0: i32) -> (i32, i32) {
    %c0_i32 = arith.constant 0 : i32
    %c0_i32_0 = arith.constant 0 : i32
    %c0_i32_1 = arith.constant 0 : i32
    return %c0_i32, %c0_i32_0 : i32, i32
  }
  func.func @transform_3(%arg0: i32) -> (i32, i32) {
    %c0_i32 = arith.constant 0 : i32
    %c0_i32_0 = arith.constant 0 : i32
    %c0_i32_1 = arith.constant 0 : i32
    return %c0_i32, %c0_i32_0 : i32, i32
  }
  func.func @transform_4(%arg0: i32) -> (i32, i32) {
    %c0_i32 = arith.constant 0 : i32
    %c0_i32_0 = arith.constant 0 : i32
    %c0_i32_1 = arith.constant 0 : i32
    return %c0_i32, %c0_i32_0 : i32, i32
  }
  func.func @transform_5(%arg0: i32) -> (i32, i32) {
    %c0_i32 = arith.constant 0 : i32
    %c0_i32_0 = arith.constant 0 : i32
    return %arg0, %c0_i32 : i32, i32
  }
}

</mosaic_0001>

<bundles_post_ra>
// kernel: tpu_custom_call.1
= control target key start
LH: loop header
LB: loop body
LE: loop exit
PB: predicated region body
PF: predicated region fallthrough
CT: control target
= control target key end

     0   :  { %v358_v1 = vmov 0.0   ;;  %vm359_vm0 = vmmov 0   ;;  %vm33_vm1 = vcmask 261120   ;;  %s493_s0 = inlined_call_operand.vmem [shape: f32[8,32], index: 0, kind: input, shape index: {}]   ;;  %s494_s1 = inlined_call_operand.vmem [shape: f32[32,128], index: 1, kind: input, shape index: {}]   ;;  %s495_s2 = inlined_call_operand.vmem [shape: f32[1,128], index: 2, kind: input, shape index: {}]   ;;  %s496_s3 = inlined_call_operand.vmem [shape: f32[128,4], index: 3, kind: input, shape index: {}]   ;;  %s497_s4 = inlined_call_operand.vmem [shape: f32[1,4], index: 4, kind: input, shape index: {}]   ;;  %s498_s5 = inlined_call_operand.hbm [shape: f32[8,8], index: 5, kind: output, shape index: {}]  }
   0x1   :  { %v25_v0 = vld [vmem:[%s494_s1 + $0x18] sm:$0xff]  ;;  %282 = vmatprep.subr.mxu0 %v358_v1  ;;  %v24_v2 = vld [vmem:[%s494_s1 + $0x10] sm:$0xff]  ;;  %290 = vmatprep.mubr.msk.f32.mxu0 %vm359_vm0, %v358_v1  ;;  %v23_v5 = vld [vmem:[%s494_s1 + $0x8] sm:$0xff] }
   0x2   :  { %v123_v3 = vld [vmem:[%s496_s3 + $0x78] sm:$0xff]  ;;  %283 = vmatpush3.msra.mxu0 %v25_v0  ;;  %293 = vmatprep.subr.mxu1 %v358_v1  ;;  %v122_v4 = vld [vmem:[%s496_s3 + $0x70] sm:$0xff]  ;;  %v121_v6 = vld [vmem:[%s496_s3 + $0x68] sm:$0xff] }
   0x3   :  { %284 = vmatprep.subr.mxu0 %v358_v1  ;;  %294 = vmatpush3.msra.mxu1 %v123_v3  ;;  %v22_v7 = vld [vmem:[%s494_s1] sm:$0xff] }
   0x4   :  { %285 = vmatpush3.msra.mxu0 %v24_v2  ;;  %295 = vmatprep.subr.mxu1 %v358_v1  ;;  %v21_v8 = vld [vmem:[%s493_s0] sm:$0xff] }
   0x5   :  { %286 = vmatprep.subr.mxu0 %v358_v1  ;;  %296 = vmatpush3.msra.mxu1 %v122_v4  ;;  %v120_v9 = vld [vmem:[%s496_s3 + $0x60] sm:$0xff] }
   0x6   :  { %287 = vmatpush3.msra.mxu0 %v23_v5  ;;  %297 = vmatprep.subr.mxu1 %v358_v1 }
   0x7   :  { %10 = vsyncpa [#allocation3], 0  ;;  %288 = vmatprep.subr.mxu0 %v358_v1  ;;  %298 = vmatpush3.msra.mxu1 %v121_v6  ;;  %v119_v10 = vld [vmem:[%s496_s3 + $0x58] sm:$0xff]  ;;  %v118_v11 = vld [vmem:[%s496_s3 + $0x50] sm:$0xff]  ;;  %vm201_vm2 = vcmask 31744   ;;  %v213_v32 = vlaneseq  ;;  %vm240_vm6 = vcmask 64512  }
   0x8   :  { %289 = vmatpush3.msra.mxu0 %v22_v7  ;;  %299 = vmatprep.subr.mxu1 %v358_v1  ;;  %v117_v12 = vld [vmem:[%s496_s3 + $0x48] sm:$0xff]  ;;  %v116_v13 = vld [vmem:[%s496_s3 + $0x40] sm:$0xff]  ;;  %v115_v14 = vld [vmem:[%s496_s3 + $0x38] sm:$0xff] }
   0x9   :  { %291 = vmatmul.mubr.msk.f32.vlgmr.msra.gmra.mxu0 %vm33_vm1, %v21_v8  ;;  %300 = vmatpush3.msra.mxu1 %v120_v9  ;;  %v114_v15 = vld [vmem:[%s496_s3 + $0x30] sm:$0xff]  ;;  %v113_v16 = vld [vmem:[%s496_s3 + $0x28] sm:$0xff]  ;;  %v112_v17 = vld [vmem:[%s496_s3 + $0x20] sm:$0xff]  ;;  %v214_v33 = vand.u32 127, %v213_v32 }
   0xa   :  { %301 = vmatprep.subr.mxu1 %v358_v1  ;;  %325 = vmatprep.mubr.msk.f32.mxu1 %vm359_vm0, %v358_v1  ;;  %v111_v18 = vld [vmem:[%s496_s3 + $0x18] sm:$0xff]  ;;  %v110_v19 = vld [vmem:[%s496_s3 + $0x10] sm:$0xff]  ;;  %v109_v20 = vld [vmem:[%s496_s3 + $0x8] sm:$0xff] }
   0xb   :  { %302 = vmatpush3.msra.mxu1 %v119_v10  ;;  %v108_v21 = vld [vmem:[%s496_s3] sm:$0xff]  ;;  %s361_s3 = smov [#allocation2]  }
   0xc   :  { %303 = vmatprep.subr.mxu1 %v358_v1  ;;  %v256_v22 = vld [vmem:[%s495_s2] ss:$0 sm:$0xff]  ;;  %s360_s2 = smov 4  }
   0xd   :  { %304 = vmatpush3.msra.mxu1 %v118_v11  ;;  %v258_v27 = vld [vmem:[%s497_s4] ss:$0 sm:$0xff]  ;;  %s248_s4 = sshll.u32 %s361_s3, 4  ;;  %s249_s4 = int_to_ptr.vmem [resolvable:$true] %s248_s4 }
   0xe   :  { %305 = vmatprep.subr.mxu1 %v358_v1  ;;  %s336_s11 = scalar_lea.vmem %s249_s4, 128  ;;  %p341_p1 = scmp.lt.s32.totalorder %s249_s4, %s249_s4 }
   0xf   :  { %306 = vmatpush3.msra.mxu1 %v117_v12  ;;  %p337_p0 = scmp.ne.s32.totalorder %s249_s4, %s336_s11  ;;  %p342_p2 = scmp.lt.s32.totalorder %s336_s11, %s336_s11 }
  0x10   :  { %307 = vmatprep.subr.mxu1 %v358_v1 }
  0x11   :  { %308 = vmatpush3.msra.mxu1 %v116_v13  ;;  %p343_p3 = por %p342_p2, %p341_p1 }
  0x12   :  { %309 = vmatprep.subr.mxu1 %v358_v1 }
  0x13   :  { %310 = vmatpush3.msra.mxu1 %v115_v14  ;;  %p344_p4 = pnand %p343_p3, %p337_p0 }
  0x14   :  { %311 = vmatprep.subr.mxu1 %v358_v1 }
  0x15   :  { %312 = vmatpush3.msra.mxu1 %v114_v15 }
  0x16   :  { %313 = vmatprep.subr.mxu1 %v358_v1 }
  0x17   :  { %314 = vmatpush3.msra.mxu1 %v113_v16 }
  0x18   :  { %315 = vmatprep.subr.mxu1 %v358_v1 }
  0x19   :  { %316 = vmatpush3.msra.mxu1 %v112_v17 }
  0x1a   :  { %317 = vmatprep.subr.mxu1 %v358_v1 }
  0x1b   :  { %318 = vmatpush3.msra.mxu1 %v111_v18 }
  0x1c   :  { %319 = vmatprep.subr.mxu1 %v358_v1 }
  0x1d   :  { %320 = vmatpush3.msra.mxu1 %v110_v19 }
  0x1e   :  { %321 = vmatprep.subr.mxu1 %v358_v1 }
  0x1f   :  { %322 = vmatpush3.msra.mxu1 %v109_v20 }
  0x20   :  { %323 = vmatprep.subr.mxu1 %v358_v1 }
  0x21   :  { %324 = vmatpush3.msra.mxu1 %v108_v21 }
  0xc9   :  { %v103_v23 = vpop.f32.mrf.mxu0 }
  0xca   :  { %v104_v24 = vadd.f32 %v256_v22, %v103_v23 }
  0xcb   :  { %v292_v25 = vpop.f32.mrf.mxu0 }
  0xcc   :  { %v107_v26 = vmax.f32 %v104_v24, 0.0 }
  0xce   :  { %326 = vmatmul.mubr.f32.vlgmr.msra.gmra.mxu1 %v107_v26 }
 0x18e   :  { %v197_v28 = vpop.f32.mrf.mxu1 }
 0x18f   :  { %v198_v29 = vadd.f32 %v258_v27, %v197_v28 }
 0x190   :  { %v327_v30 = vpop.f32.mrf.mxu1 }
 0x191   :  { %v202_v31 = vsel %vm201_vm2, %v198_v29, -inf }
 0x192   :  { %203 = vmax.xlane.f32.xlu0 %v202_v31 }
 0x21b   :  { %v204_v34 = vpop.xlane.xlu0 %203 }
 0x21c   :  { %v205_v35 = vsub.f32 %v198_v29, %v204_v34  ;;  %vm215_vm3 = vcmp.eq.f32.partialorder %v198_v29, %v204_v34 }
 0x21d   :  { %v216_v36 = vsel %vm215_vm3, %v214_v33, 4 }
 0x21e   :  { %v206_v37 = vmul.f32 1.442695, %v205_v35  ;;  %v217_v38 = vsel %vm201_vm2, %v216_v36, 2147483647 }
 0x21f   :  { %v219_v39 = vshra.s32 %v217_v38, 16  ;;  %v218_v43 = vand.u32 65535, %v217_v38 }
 0x220   :  { %332 = vpow2.f32 %v206_v37 }
 0x221   :  { %v221_v40 = vcvt.s32.f32 %v219_v39  ;;  %v220_v45 = vcvt.s32.f32 %v218_v43 }
 0x223   :  { %222 = vmin.xlane.f32.xlu0 %v221_v40 }
 0x22d   :  { %v333_v41 = vpop.eup %332 }
 0x22e   :  { %v208_v42 = vsel %vm201_vm2, %v333_v41, 0.0 }
 0x22f   :  { %209 = vadd.xlane.f32.xlu1 %v208_v42 }
 0x2ac   :  { %v223_v44 = vpop.xlane.xlu0 %222 }
 0x2ad   :  { %vm224_vm4 = vcmp.eq.f32.partialorder %v221_v40, %v223_v44  ;;  %v229_v50 = vcvt.f32.s32 %v223_v44 }
 0x2ae   :  { %v225_v46 = vsel %vm224_vm4, %v220_v45, inf }
 0x2af   :  { %226 = vmin.xlane.f32.xlu1 %v225_v46  ;;  %v230_v52 = vshll.u32 %v229_v50, 16 }
 0x2b8   :  { %v210_v47 = vpop.xlane.xlu1 %209 }
 0x2b9   :  { %334 = vrcp.f32 %v210_v47 }
 0x2c6   :  { %v335_v48 = vpop.eup %334 }
 0x2c7   :  { %v212_v49 = vmul.f32 %v335_v48, %v333_v41 }
 0x2c9   :  { %236 = vrot.lane.b32.xlu0 %v212_v49, %s360_s2 }
 0x338   :  { %v227_v51 = vpop.xlane.xlu1 %226 }
 0x339   :  { %v228_v53 = vcvt.f32.s32 %v227_v51 }
 0x33b   :  { %v231_v54 = vadd.s32 %v230_v52, %v228_v53  ;;  %v237_v55 = vpop.permute.xlu0 %236 }
 0x33d   :  { %vm232_vm5 = vcmp.eq.s32.totalorder %v214_v33, %v231_v54 }
 0x33e   :  { %v259_v56 = vsel %vm232_vm5, 1.0, %v358_v1 }
 0x33f   :  { %v239_v57 = vsel %vm201_vm2, %v259_v56, %v237_v55 }
 0x340   :  { %241 = vst.msk [vmem:[#allocation2] sm:$0xff] %vm240_vm6, %v239_v57 }
 0x341   :  { %347 = shalt.err (!%p344_p4)
}
 0x342   :  { %251 = dma.vmem_to_hbm [thread:$0]  %s249_s4, 128, %s498_s5, [#allocation3]  }
 0x343   :  { %356 = dma.done.wait [#allocation3], 128  }
 0x344   :  { %357 = vsyncadd [#allocation3], 4294967168 }
 0x345   :  { %255 = vsyncpa [#allocation3], 1 }

</bundles_post_ra>
